<compile_context>
chip_gen: v6e
topology: v6e:2x2x1
jax: 0.10.0
libtpu: 0.0.40
codegen_flags: <defaults>
</compile_context>

<pallas_src>
import functools
import math

import jax
import jax.numpy as jnp
from jax import lax
from jax.experimental import pallas as pl
from jax.experimental.pallas import tpu as pltpu


def _gcn_kernel(x_ref, adj_ref, w_ref, pre_out_ref, cur_out_ref, *, n_pre):
    # x_ref holds [pre; cur] stacked along rows: (N_pre + N_cur, F_in).
    x = x_ref[...]
    adj = adj_ref[...]
    w = w_ref[...]

    # Single fused feature projection for both node sets (one MXU pass).
    proj = jnp.dot(x, w, preferred_element_type=jnp.float32)
    pre_proj = proj[:n_pre, :]   # == pre @ W
    cur_proj = proj[n_pre:, :]   # == cur @ W

    # Message passing across the bipartite adjacency.
    #   p = adj @ cur_proj                       (N_pre, F_out)
    #   c = adj.T @ pre_proj  -> contract dim 0  (N_cur, F_out), no transpose.
    p = jnp.dot(adj, cur_proj, preferred_element_type=jnp.float32)
    c = lax.dot_general(
        adj, pre_proj,
        dimension_numbers=(((0,), (0,)), ((), ())),
        preferred_element_type=jnp.float32)

    # F.leaky_relu default negative_slope = 0.01; maximum == leaky_relu for
    # slope in (0, 1).
    slope = jnp.float32(0.01)
    pre_out_ref[...] = jnp.maximum(p, slope * p).astype(pre_out_ref.dtype)
    cur_out_ref[...] = jnp.maximum(c, slope * c).astype(cur_out_ref.dtype)


def graph_convolution(pre, cur, adj, weight):
    n_pre, f_in = pre.shape
    n_cur, _ = cur.shape
    f_out = weight.shape[1]
    n_tot = n_pre + n_cur

    # Fuse the two projections: one (N_pre+N_cur, F_in) operand.
    x = jnp.concatenate([pre, cur], axis=0)

    flops = 2 * (n_tot * f_in * f_out          # fused projection
                 + n_pre * n_cur * f_out       # adj   @ cur_
                 + n_cur * n_pre * f_out)      # adj.T @ pre_
    bytes_accessed = 4 * (n_tot * f_in + n_pre * n_cur + f_in * f_out
                          + n_pre * f_out + n_cur * f_out)

    return pl.pallas_call(
        functools.partial(_gcn_kernel, n_pre=n_pre),
        out_shape=(
            jax.ShapeDtypeStruct((n_pre, f_out), jnp.float32),
            jax.ShapeDtypeStruct((n_cur, f_out), jnp.float32),
        ),
        in_specs=[
            pl.BlockSpec((n_tot, f_in), lambda: (0, 0)),
            pl.BlockSpec((n_pre, n_cur), lambda: (0, 0)),
            pl.BlockSpec((f_in, f_out), lambda: (0, 0)),
        ],
        out_specs=(
            pl.BlockSpec((n_pre, f_out), lambda: (0, 0)),
            pl.BlockSpec((n_cur, f_out), lambda: (0, 0)),
        ),
        cost_estimate=pl.CostEstimate(
            flops=flops, transcendentals=0, bytes_accessed=bytes_accessed),
        compiler_params=pltpu.CompilerParams(vmem_limit_bytes=32 << 20),
    )(x, adj, weight)


def reference(pre, cur, adj, weight):
    pre_ = pre @ weight
    cur_ = cur @ weight
    p = adj @ cur_
    c = adj.T @ pre_
    lrelu = lambda v: jnp.where(v > 0, v, 0.01 * v)
    return lrelu(p), lrelu(c)


if __name__ == "__main__":
    in_features = 32
    out_features = 32
    n_pre = 16
    n_cur = 8

    key = jax.random.PRNGKey(0)
    k_w, k_pre, k_cur, k_adj = jax.random.split(key, 4)

    # Deterministic init matching reset_parameters: uniform(-stdv, stdv),
    # stdv = 1 / sqrt(out_features).
    stdv = 1.0 / math.sqrt(out_features)
    weight = jax.random.uniform(
        k_w, (in_features, out_features), dtype=jnp.float32,
        minval=-stdv, maxval=stdv)

    pre = jax.random.normal(k_pre, (n_pre, in_features), dtype=jnp.float32)
    cur = jax.random.normal(k_cur, (n_cur, in_features), dtype=jnp.float32)
    adj = jax.random.uniform(k_adj, (n_pre, n_cur), dtype=jnp.float32)

    pre_out, cur_out = graph_convolution(pre, cur, adj, weight)
    jax.block_until_ready((pre_out, cur_out))

    ref_pre, ref_cur = reference(pre, cur, adj, weight)
    assert jnp.allclose(pre_out, ref_pre, atol=1e-5, rtol=1e-5)
    assert jnp.allclose(cur_out, ref_cur, atol=1e-5, rtol=1e-5)

    print("KERNEL_OK")
</pallas_src>

<mosaic_0001>
module attributes {stable_mosaic.version = 11 : i64} {
  func.func @_gcn_kernel(%arg0: memref<24x32xf32, #tpu.memory_space<vmem>>, %arg1: memref<16x8xf32, #tpu.memory_space<vmem>>, %arg2: memref<32x32xf32, #tpu.memory_space<vmem>>, %arg3: memref<16x32xf32, #tpu.memory_space<vmem>>, %arg4: memref<8x32xf32, #tpu.memory_space<vmem>>) attributes {dimension_semantics = [], scalar_prefetch = 0 : i64, scratch_operands = 0 : i64, tpu.core_type = #tpu.core_type<tc>} {
    %c0 = arith.constant 0 : index
    %c0_0 = arith.constant 0 : index
    %0 = vector.load %arg0[%c0, %c0_0] : memref<24x32xf32, #tpu.memory_space<vmem>>, vector<24x32xf32>
    %c0_1 = arith.constant 0 : index
    %c0_2 = arith.constant 0 : index
    %1 = vector.load %arg1[%c0_1, %c0_2] : memref<16x8xf32, #tpu.memory_space<vmem>>, vector<16x8xf32>
    %c0_3 = arith.constant 0 : index
    %c0_4 = arith.constant 0 : index
    %2 = vector.load %arg2[%c0_3, %c0_4] : memref<32x32xf32, #tpu.memory_space<vmem>>, vector<32x32xf32>
    %cst = arith.constant dense<0.000000e+00> : vector<24x32xf32>
    %3 = tpu.matmul %0, %2, %cst {dimension_numbers = #tpu.dot_dimension_numbers<[1], [0], [0], [1], [0, 0, 1, 1], [], []>} : vector<24x32xf32>, vector<32x32xf32>, vector<24x32xf32> -> vector<24x32xf32>
    %4 = vector.extract_strided_slice %3 {offsets = [0, 0], sizes = [16, 32], strides = [1, 1]} : vector<24x32xf32> to vector<16x32xf32>
    %5 = vector.extract_strided_slice %3 {offsets = [16, 0], sizes = [8, 32], strides = [1, 1]} : vector<24x32xf32> to vector<8x32xf32>
    %cst_5 = arith.constant dense<0.000000e+00> : vector<16x32xf32>
    %6 = tpu.matmul %1, %5, %cst_5 {dimension_numbers = #tpu.dot_dimension_numbers<[1], [0], [0], [1], [0, 0, 1, 1], [], []>} : vector<16x8xf32>, vector<8x32xf32>, vector<16x32xf32> -> vector<16x32xf32>
    %cst_6 = arith.constant dense<0.000000e+00> : vector<8x32xf32>
    %7 = tpu.matmul %1, %4, %cst_6 {dimension_numbers = #tpu.dot_dimension_numbers<[0], [0], [1], [1], [0, 1, 1, 1], [], []>} : vector<16x8xf32>, vector<16x32xf32>, vector<8x32xf32> -> vector<8x32xf32>
    %cst_7 = arith.constant 0.00999999977 : f32
    %8 = vector.broadcast %cst_7 : f32 to vector<16x32xf32>
    %9 = arith.mulf %8, %6 : vector<16x32xf32>
    %10 = arith.maximumf %6, %9 : vector<16x32xf32>
    %c0_8 = arith.constant 0 : index
    %c0_9 = arith.constant 0 : index
    %11 = vector.load %arg3[%c0_8, %c0_9] : memref<16x32xf32, #tpu.memory_space<vmem>>, vector<16x32xf32>
    tpu.vector_store %arg3[%c0_8, %c0_9], %10 {strides = array<i32>} : memref<16x32xf32, #tpu.memory_space<vmem>>, vector<16x32xf32>,
    %cst_10 = arith.constant 0.00999999977 : f32
    %12 = vector.broadcast %cst_10 : f32 to vector<8x32xf32>
    %13 = arith.mulf %12, %7 : vector<8x32xf32>
    %14 = arith.maximumf %7, %13 : vector<8x32xf32>
    %c0_11 = arith.constant 0 : index
    %c0_12 = arith.constant 0 : index
    %15 = vector.load %arg4[%c0_11, %c0_12] : memref<8x32xf32, #tpu.memory_space<vmem>>, vector<8x32xf32>
    tpu.vector_store %arg4[%c0_11, %c0_12], %14 {strides = array<i32>} : memref<8x32xf32, #tpu.memory_space<vmem>>, vector<8x32xf32>,
    return
  }
}

</mosaic_0001>

<bundles_post_ra>
// kernel: tpu_custom_call.1
= control target key start
LH: loop header
LB: loop body
LE: loop exit
PB: predicated region body
PF: predicated region fallthrough
CT: control target
= control target key end

     0   :  { %10 = vsyncpa [#allocation3], 0  ;;  %s552_s0 = inlined_call_operand.vmem [shape: f32[24,32], index: 0, kind: input, shape index: {}]   ;;  %s553_s1 = inlined_call_operand.vmem [shape: f32[16,8], index: 1, kind: input, shape index: {}]   ;;  %s554_s2 = inlined_call_operand.hbm [shape: f32[32,32], index: 2, kind: input, shape index: {}]   ;;  %s555_s3 = inlined_call_operand.hbm [shape: f32[16,32], index: 3, kind: output, shape index: {0}]   ;;  %s556_s4 = inlined_call_operand.hbm [shape: f32[8,32], index: 4, kind: output, shape index: {1}]  }
   0x1   :  { %11 = vsyncpa [#allocation4], 0 }
   0x2   :  { %12 = vsyncpa [#allocation7], 0  ;;  %s480_s15 = smov [#allocation2]  }
   0x3   :  { %s22_s16 = sshll.u32 %s480_s15, 4  ;;  %s23_s16 = int_to_ptr.vmem [resolvable:$true] %s22_s16 }
   0x4   :  { %s422_s17 = scalar_lea.vmem %s23_s16, 512  ;;  %p427_p1 = scmp.lt.s32.totalorder %s23_s16, %s23_s16 }
   0x5   :  { %p423_p0 = scmp.ne.s32.totalorder %s23_s16, %s422_s17  ;;  %p428_p2 = scmp.lt.s32.totalorder %s422_s17, %s422_s17 }
   0x7   :  { %p429_p3 = por %p428_p2, %p427_p1 }
   0x9   :  { %p430_p4 = pnand %p429_p3, %p423_p0 }
   0xb   :  { %433 = shalt.err (!%p430_p4)
}
   0xc   :  { %s481_s18 = smov 128   ;;  %s482_s19 = smov 8  }
   0xd   :  { %28 = dma.hbm_to_vmem [thread:$0]  %s554_s2, 512, %s23_s16, [#allocation3], %s481_s18, %s481_s18, %s482_s19  }
   0xe   :  { %474 = dma.done.wait [#allocation3], 512  }
   0xf   :  { %475 = vsyncadd [#allocation3], 4294966784  ;;  %v483_v0 = vmov 0.0   ;;  %vm484_vm0 = vmmov 0   ;;  %v40_v1 = vld [vmem:[#allocation2 + $0x18] sm:$0xff]  ;;  %v39_v2 = vld [vmem:[#allocation2 + $0x10] sm:$0xff] }
  0x10   :  { %378 = vmatprep.subr.mxu0 %v483_v0  ;;  %386 = vmatprep.mubr.msk.f32.mxu0 %vm484_vm0, %v483_v0  ;;  %v38_v3 = vld [vmem:[#allocation2 + $0x8] sm:$0xff]  ;;  %v35_v4 = vld [vmem:[%s553_s1] sm:$0xff]  ;;  %vm41_vm1 = vcmask 261120   ;;  %v34_v9 = vld [vmem:[%s552_s0 + $0x10] sm:$0xff]  ;;  %vm131_vm2 = vcmask 64512   ;;  %vm245_vm3 = vcmask 130048  }
  0x11   :  { %379 = vmatpush3.msra.mxu0 %v40_v1  ;;  %213 = vxpose.xlu0.b32.start [1/2] (short) (narrow) %v35_v4, 8  ;;  %v37_v5 = vld [vmem:[#allocation2] sm:$0xff]  ;;  %v36_v6 = vld [vmem:[%s553_s1 + $0x8] sm:$0xff]  ;;  %s486_s5 = smov [#allocation6]  }
  0x12   :  { %380 = vmatprep.subr.mxu0 %v483_v0  ;;  %v32_v7 = vld [vmem:[%s552_s0] sm:$0xff]  ;;  %v33_v8 = vld [vmem:[%s552_s0 + $0x8] sm:$0xff]  ;;  %397 = vmatprep.mubr.msk.f32.mxu1 %vm131_vm2, %v35_v4  ;;  %s485_s0 = smov [#allocation5]   ;;  %s346_s6 = sshll.u32 %s486_s5, 4  ;;  %s347_s6 = int_to_ptr.vmem [resolvable:$true] %s346_s6 }
  0x13   :  { %381 = vmatpush3.msra.mxu0 %v39_v2  ;;  %s333_s30 = sshll.u32 %s485_s0, 4  ;;  %s334_s30 = int_to_ptr.vmem [resolvable:$true] %s333_s30 }
  0x14   :  { %382 = vmatprep.subr.mxu0 %v483_v0  ;;  %s434_s7 = scalar_lea.vmem %s334_s30, 256  ;;  %p439_p6 = scmp.lt.s32.totalorder %s334_s30, %s334_s30 }
  0x15   :  { %383 = vmatpush3.msra.mxu0 %v38_v3  ;;  %214 = vxpose.xlu0.b32.end [2/2] (short) (narrow) %v36_v6, 8  ;;  %p435_p5 = scmp.ne.s32.totalorder %s334_s30, %s434_s7  ;;  %p440_p7 = scmp.lt.s32.totalorder %s434_s7, %s434_s7 }
  0x16   :  { %384 = vmatprep.subr.mxu0 %v483_v0 }
  0x17   :  { %385 = vmatpush3.msra.mxu0 %v37_v5  ;;  %p441_p8 = por %p440_p7, %p439_p6 }
  0x18   :  { %387 = vmatmul.mubr.msk.f32.vlgmr.msra.gmra.mxu0 %vm41_vm1, %v32_v7 }
  0x19   :  { %389 = vmatprep.mubr.msk.f32.mxu0 %vm484_vm0, %v483_v0  ;;  %p442_p9 = pnand %p441_p8, %p435_p5 }
  0x1c   :  { %390 = vmatmul.mubr.msk.f32.gmra.mxu0 %vm41_vm1, %v33_v8 }
  0x1d   :  { %392 = vmatprep.mubr.msk.f32.mxu0 %vm484_vm0, %v483_v0 }
  0x20   :  { %393 = vmatmul.mubr.msk.f32.gmra.mxu0 %vm41_vm1, %v34_v9 }
  0x8d   :  { %v229_v16 = vpop.trf.xlu0 }
  0xd8   :  { %v117_v10 = vpop.f32.mrf.mxu0 }
  0xda   :  { %v388_v11 = vpop.f32.mrf.mxu0 }
  0xdc   :  { %v122_v12 = vpop.f32.mrf.mxu0 }
  0xde   :  { %v391_v13 = vpop.f32.mrf.mxu0 }
  0xe0   :  { %v127_v14 = vpop.f32.mrf.mxu0 }
  0xe1   :  { %395 = vmatprep.subr.mxu1 %v127_v14 }
  0xe2   :  { %v394_v15 = vpop.f32.mrf.mxu0  ;;  %396 = vmatpush3.msra.mxu1 %v127_v14 }
  0xe3   :  { %398 = vmatmul.mubr.msk.f32.vlgmr.msra.gmra.mxu1 %vm131_vm2, %v36_v6  ;;  %400 = vmatprep.subr.mxu1 %v483_v0 }
  0xe4   :  { %401 = vmatpush3.msra.mxu1 %v122_v12  ;;  %404 = vmatprep.mubr.msk.f32.mxu1 %vm484_vm0, %v483_v0 }
  0xe5   :  { %402 = vmatprep.subr.mxu1 %v483_v0 }
  0xe6   :  { %403 = vmatpush3.msra.mxu1 %v117_v10 }
  0xe7   :  { %405 = vmatmul.mubr.msk.f32.vlgmr.msra.gmra.mxu1 %vm245_vm3, %v229_v16 }
 0x1a3   :  { %v399_v17 = vpop.f32.mrf.mxu1 }
 0x1a4   :  { %v320_v18 = vmul.f32 0.01, %v399_v17 }
 0x1a5   :  { %v204_v19 = vpop.f32.mrf.mxu1 }
 0x1a6   :  { %v322_v20 = vmax.f32 %v399_v17, %v320_v18  ;;  %v319_v21 = vmul.f32 0.01, %v204_v19 }
 0x1a7   :  { %v315_v22 = vpop.f32.mrf.mxu1 }
 0x1a8   :  { %324 = vst.msk [vmem:[#allocation5 + $0x8] sm:$0xff] %vm41_vm1, %v322_v20  ;;  %v321_v23 = vmax.f32 %v204_v19, %v319_v21  ;;  %v325_v24 = vmul.f32 0.01, %v315_v22 }
 0x1a9   :  { %v406_v25 = vpop.f32.mrf.mxu1 }
 0x1aa   :  { %323 = vst.msk [vmem:[#allocation5] sm:$0xff] %vm41_vm1, %v321_v23  ;;  %v326_v26 = vmax.f32 %v315_v22, %v325_v24 }
 0x1ab   :  { %445 = shalt.err (!%p442_p9)
}
 0x1ac   :  { %339 = dma.vmem_to_hbm [thread:$0]  %s334_s30, 256, %s555_s3, [#allocation4], %s481_s18, %s481_s18, %s482_s19   ;;  %327 = vst.msk [vmem:[#allocation6] sm:$0xff] %vm41_vm1, %v326_v26 }
 0x1ad   :  { %s454_s10 = scalar_lea.vmem %s347_s6, 128  ;;  %p459_p11 = scmp.lt.s32.totalorder %s347_s6, %s347_s6 }
 0x1ae   :  { %p455_p10 = scmp.ne.s32.totalorder %s347_s6, %s454_s10  ;;  %p460_p12 = scmp.lt.s32.totalorder %s454_s10, %s454_s10 }
 0x1b0   :  { %p461_p13 = por %p460_p12, %p459_p11 }
 0x1b2   :  { %p462_p0 = pnand %p461_p13, %p455_p10 }
 0x1b4   :  { %465 = shalt.err (!%p462_p0)
}
 0x1b5   :  { %349 = dma.vmem_to_hbm [thread:$0]  %s347_s6, 128, %s556_s4, [#allocation7]  }
 0x1b6   :  { %476 = dma.done.wait [#allocation4], 256  }
 0x1b7   :  { %477 = vsyncadd [#allocation4], 4294967040 }
 0x1b8   :  { %478 = dma.done.wait [#allocation7], 128  }
 0x1b9   :  { %479 = vsyncadd [#allocation7], 4294967168 }
 0x1ba   :  { %356 = vsyncpa [#allocation3], 1 }
 0x1bb   :  { %357 = vsyncpa [#allocation4], 1 }
 0x1bc   :  { %358 = vsyncpa [#allocation7], 1 }

</bundles_post_ra>
